<compile_context>
chip_gen: v6e
topology: v6e:2x2x1
jax: 0.10.0
libtpu: 0.0.40
codegen_flags: <defaults>
</compile_context>

<pallas_src>
import functools

import jax
import jax.numpy as jnp
from jax.experimental import pallas as pl
from jax.experimental.pallas import tpu as pltpu

_LANE = 128
_MAX_TILE_ROWS = 512  # 512 rows x 1024 lanes x 4B = 2 MiB per block


def _dropout_kernel(seed_ref, x_ref, o_ref, *, threshold, tile_elems):
    """out = x where hash(global_index, seed) < threshold else 0."""
    tr, cols = x_ref.shape

    # Global element index of every lane in this tile (unique across the grid,
    # so every tile gets an independent random stream).
    base = pl.program_id(0) * tile_elems
    row = jax.lax.broadcasted_iota(jnp.int32, (tr, cols), 0)
    col = jax.lax.broadcasted_iota(jnp.int32, (tr, cols), 1)
    idx = base + row * cols + col

    # Stateless counter-based PRNG: mix counter with seed, then a lowbias32-
    # style avalanche hash -> uniform uint32 bits.
    # TODO(synk): on a pure-TPU build this could use the hardware PRNG
    # (pltpu.prng_seed / pltpu.prng_random_bits) instead of a software hash.
    h = idx.astype(jnp.uint32) + seed_ref[0].astype(jnp.uint32) * jnp.uint32(0x9E3779B9)
    h = h ^ (h >> 16)
    h = h * jnp.uint32(0x7FEB352D)
    h = h ^ (h >> 15)
    h = h * jnp.uint32(0x846CA68B)
    h = h ^ (h >> 16)

    # Bernoulli(keep_prob) via integer threshold compare + single select.
    xv = x_ref[...]
    o_ref[...] = jnp.where(h < jnp.uint32(threshold), xv, jnp.zeros_like(xv))


def _round_up(a, b):
    return (a + b - 1) // b * b


def _pick_cols(n):
    # Largest lane-dense column count that still gives >= 8 rows of work.
    for c in (1024, 512, 256):
        if n >= c * 8:
            return c
    return _LANE


def dropout(x, p=0.5, *, seed=0, training=True):
    """Forward pass of the reference Dropout module (no 1/(1-p) rescale)."""
    if not training or p == 0.0:
        return x

    orig_shape = x.shape
    n = x.size

    # Lane-dense 2-D slab: cols is a multiple of 128; rows tiled by the grid.
    cols = _pick_cols(n)
    rows_needed = pl.cdiv(n, cols)

    # Sublane multiple for the tile's second-to-last dim (8 for 4B dtypes,
    # 16 for 2B, 32 for 1B — packed-dtype friendly).
    itemsize = jnp.dtype(x.dtype).itemsize
    sub = max(8, 32 // itemsize)
    tile_rows = min(_MAX_TILE_ROWS, _round_up(rows_needed, sub))
    rows = _round_up(rows_needed, tile_rows)
    grid = rows // tile_rows

    pad = rows * cols - n
    flat = x.reshape(-1)
    if pad:
        flat = jnp.pad(flat, (0, pad))
    x2 = flat.reshape(rows, cols)

    keep_prob = 1.0 - float(p)
    threshold = min(int(round(keep_prob * float(1 << 32))), (1 << 32) - 1)

    seed_arr = jnp.array([seed], dtype=jnp.int32)

    kernel = functools.partial(
        _dropout_kernel, threshold=threshold, tile_elems=tile_rows * cols
    )

    out2 = pl.pallas_call(
        kernel,
        grid=(grid,),
        out_shape=jax.ShapeDtypeStruct((rows, cols), x2.dtype),
        in_specs=[
            pl.BlockSpec(memory_space=pltpu.MemorySpace.SMEM),       # seed scalar
            pl.BlockSpec((tile_rows, cols), lambda i: (i, 0)),        # x tiles
        ],
        out_specs=pl.BlockSpec((tile_rows, cols), lambda i: (i, 0)),
        compiler_params=pltpu.CompilerParams(
            dimension_semantics=("parallel",)
        ),
    )(seed_arr, x2)

    out = out2.reshape(-1)
    if pad:
        out = out[:n]
    return out.reshape(orig_shape)


if __name__ == "__main__":
    key = jax.random.PRNGKey(0)
    # Small NCHW input consistent with a conv-net feature map.
    x = jax.random.normal(key, (2, 4, 16, 16), dtype=jnp.float32)

    p = 0.5
    y = dropout(x, p=p, seed=1234, training=True)
    y = jax.block_until_ready(y)

    # Shape/dtype preserved; every output element is either 0 (dropped) or
    # exactly equal to the corresponding input (kept).
    assert y.shape == x.shape and y.dtype == x.dtype
    kept_or_zero = jnp.logical_or(y == 0.0, y == x)
    assert bool(jnp.all(kept_or_zero))

    # Keep-rate should be roughly 1 - p over 2048 elements.
    keep_rate = float(jnp.mean(y == x))
    assert 0.3 < keep_rate < 0.7, keep_rate

    # Eval mode / p == 0 are the identity.
    y_eval = jax.block_until_ready(dropout(x, p=p, training=False))
    assert bool(jnp.all(y_eval == x))
    y_p0 = jax.block_until_ready(dropout(x, p=0.0, training=True))
    assert bool(jnp.all(y_p0 == x))

    print("KERNEL_OK")
</pallas_src>

<mosaic_0001>
module attributes {stable_mosaic.version = 11 : i64} {
  func.func @_dropout_kernel(%arg0: i32, %arg1: memref<1xi32, #tpu.memory_space<smem>>, %arg2: memref<8x256xf32, #tpu.memory_space<vmem>>, %arg3: memref<8x256xf32, #tpu.memory_space<vmem>>) attributes {dimension_semantics = [#tpu.dimension_semantics<parallel>], iteration_bounds = array<i64: 1>, scalar_prefetch = 0 : i64, scratch_operands = 0 : i64, tpu.core_type = #tpu.core_type<tc>, window_params = [{transform_indices = @transform_0, window_bounds = array<i64: 1>}, {transform_indices = @transform_1, window_bounds = array<i64: 8, 256>}, {transform_indices = @transform_2, window_bounds = array<i64: 8, 256>}]} {
    %c2048_i32 = arith.constant 2048 : i32
    %0 = arith.muli %arg0, %c2048_i32 : i32
    %1 = tpu.iota {dimensions = array<i32: 0>} : vector<8x256xi32>
    %2 = tpu.iota {dimensions = array<i32: 1>} : vector<8x256xi32>
    %c256_i32 = arith.constant 256 : i32
    %3 = vector.broadcast %c256_i32 : i32 to vector<8x256xi32>
    %4 = arith.muli %1, %3 : vector<8x256xi32>
    %5 = vector.broadcast %0 : i32 to vector<8x256xi32>
    %6 = arith.addi %5, %4 : vector<8x256xi32>
    %7 = arith.addi %6, %2 : vector<8x256xi32>
    %c0 = arith.constant 0 : index
    %8 = memref.load %arg1[%c0] : memref<1xi32, #tpu.memory_space<smem>>
    %c-1640531527_i32 = arith.constant -1640531527 : i32
    %9 = arith.muli %8, %c-1640531527_i32 : i32
    %10 = vector.broadcast %9 : i32 to vector<8x256xi32>
    %11 = arith.addi %7, %10 : vector<8x256xi32>
    %c16_i32 = arith.constant 16 : i32
    %12 = vector.broadcast %c16_i32 : i32 to vector<8x256xi32>
    %13 = arith.shrui %11, %12 : vector<8x256xi32>
    %14 = arith.xori %11, %13 : vector<8x256xi32>
    %c2146121005_i32 = arith.constant 2146121005 : i32
    %15 = vector.broadcast %c2146121005_i32 : i32 to vector<8x256xi32>
    %16 = arith.muli %14, %15 : vector<8x256xi32>
    %c15_i32 = arith.constant 15 : i32
    %17 = vector.broadcast %c15_i32 : i32 to vector<8x256xi32>
    %18 = arith.shrui %16, %17 : vector<8x256xi32>
    %19 = arith.xori %16, %18 : vector<8x256xi32>
    %c-2073254261_i32 = arith.constant -2073254261 : i32
    %20 = vector.broadcast %c-2073254261_i32 : i32 to vector<8x256xi32>
    %21 = arith.muli %19, %20 : vector<8x256xi32>
    %c16_i32_0 = arith.constant 16 : i32
    %22 = vector.broadcast %c16_i32_0 : i32 to vector<8x256xi32>
    %23 = arith.shrui %21, %22 : vector<8x256xi32>
    %24 = arith.xori %21, %23 : vector<8x256xi32>
    %c0_1 = arith.constant 0 : index
    %c0_2 = arith.constant 0 : index
    %25 = vector.load %arg2[%c0_1, %c0_2] : memref<8x256xf32, #tpu.memory_space<vmem>>, vector<8x256xf32>
    %c-2147483648_i32 = arith.constant -2147483648 : i32
    %26 = vector.broadcast %c-2147483648_i32 : i32 to vector<8x256xi32>
    %27 = arith.cmpi ult, %24, %26 : vector<8x256xi32>
    %cst = arith.constant 0.000000e+00 : f32
    %28 = vector.broadcast %cst : f32 to vector<8x256xf32>
    %29 = arith.select %27, %25, %28 : vector<8x256xi1>, vector<8x256xf32>
    %c0_3 = arith.constant 0 : index
    %c0_4 = arith.constant 0 : index
    %30 = vector.load %arg3[%c0_3, %c0_4] : memref<8x256xf32, #tpu.memory_space<vmem>>, vector<8x256xf32>
    tpu.vector_store %arg3[%c0_3, %c0_4], %29 {strides = array<i32>} : memref<8x256xf32, #tpu.memory_space<vmem>>, vector<8x256xf32>,
    return
  }
  func.func @transform_0(%arg0: i32) -> i32 {
    %c0_i32 = arith.constant 0 : i32
    %c0_i32_0 = arith.constant 0 : i32
    return %c0_i32 : i32
  }
  func.func @transform_1(%arg0: i32) -> (i32, i32) {
    %c0_i32 = arith.constant 0 : i32
    %c0_i32_0 = arith.constant 0 : i32
    return %arg0, %c0_i32 : i32, i32
  }
  func.func @transform_2(%arg0: i32) -> (i32, i32) {
    %c0_i32 = arith.constant 0 : i32
    %c0_i32_0 = arith.constant 0 : i32
    return %arg0, %c0_i32 : i32, i32
  }
}

</mosaic_0001>

<bundles_post_ra>
// kernel: tpu_custom_call.1
= control target key start
LH: loop header
LB: loop body
LE: loop exit
PB: predicated region body
PF: predicated region fallthrough
CT: control target
= control target key end

     0   :  { %8 = vsyncpa [#allocation4], 0  ;;  %s152_s0 = inlined_call_operand.<no memory space> [shape: s32[1], index: 0, kind: input, shape index: {}]   ;;  %s153_s1 = inlined_call_operand.hbm [shape: f32[8,256], index: 1, kind: input, shape index: {}]   ;;  %s154_s2 = inlined_call_operand.hbm [shape: f32[8,256], index: 2, kind: output, shape index: {}]  }
   0x1   :  { %9 = vsyncpa [#allocation5], 0  ;;  %s126_s9 = smov [#allocation3]  }
   0x2   :  { %s18_s10 = sshll.u32 %s126_s9, 4  ;;  %s19_s10 = int_to_ptr.vmem [resolvable:$true] %s18_s10 }
   0x3   :  { %s90_s11 = scalar_lea.vmem %s19_s10, 256  ;;  %p95_p1 = scmp.lt.s32.totalorder %s19_s10, %s19_s10 }
   0x4   :  { %p91_p0 = scmp.ne.s32.totalorder %s19_s10, %s90_s11  ;;  %p96_p2 = scmp.lt.s32.totalorder %s90_s11, %s90_s11 }
   0x6   :  { %p97_p3 = por %p96_p2, %p95_p1 }
   0x8   :  { %p98_p4 = pnand %p97_p3, %p91_p0 }
   0xa   :  { %101 = shalt.err (!%p98_p4)
}
   0xb   :  { %21 = dma.hbm_to_vmem [thread:$0]  %s153_s1, 256, %s19_s10, [#allocation4]  }
   0xc   :  { %122 = dma.done.wait [#allocation4], 256  }
   0xd   :  { %123 = vsyncadd [#allocation4], 4294967040  ;;  %v26_v0 = vlaneseq  ;;  %s37_s16 = smul.u32 2654435769, %s152_s0  ;;  %s127_s0 = smov [#allocation6]   ;;  %v57_v25 = vld [vmem:[#allocation3] sm:$0xff] }
   0xe   :  { %s71_s1 = sshll.u32 %s127_s0, 4  ;;  %v58_v27 = vld [vmem:[#allocation3 + $0x8] sm:$0xff]  ;;  %s72_s1 = int_to_ptr.vmem [resolvable:$true] %s71_s1 }
   0xf   :  { %v27_v1 = vshrl.u32 %v26_v0, 7  ;;  %v29_v2 = vand.u32 127, %v26_v0  ;;  %v38_v5 = vstv %s37_s16  ;;  %s102_s17 = scalar_lea.vmem %s72_s1, 256  ;;  %p107_p6 = scmp.lt.s32.totalorder %s72_s1, %s72_s1 }
  0x10   :  { %p103_p5 = scmp.ne.s32.totalorder %s72_s1, %s102_s17  ;;  %p108_p7 = scmp.lt.s32.totalorder %s102_s17, %s102_s17 }
  0x11   :  { %v31_v3 = vmul.u32 256, %v27_v1  ;;  %v30_v4 = vadd.s32 128, %v29_v2 }
  0x12   :  { %p109_p8 = por %p108_p7, %p107_p6 }
  0x13   :  { %v34_v6 = vadd.s32 %v31_v3, %v29_v2  ;;  %v35_v7 = vadd.s32 %v31_v3, %v30_v4 }
  0x14   :  { %p110_p9 = pnand %p109_p8, %p103_p5 }
  0x15   :  { %v39_v8 = vadd.s32 %v38_v5, %v34_v6  ;;  %v40_v9 = vadd.s32 %v38_v5, %v35_v7 }
  0x17   :  { %v41_v10 = vshrl.u32 %v39_v8, 16  ;;  %v42_v11 = vshrl.u32 %v40_v9, 16 }
  0x19   :  { %v43_v12 = vxor.u32 %v41_v10, %v39_v8  ;;  %v44_v13 = vxor.u32 %v42_v11, %v40_v9 }
  0x1b   :  { %v45_v14 = vmul.u32 2146121005, %v43_v12  ;;  %v46_v15 = vmul.u32 2146121005, %v44_v13 }
  0x1d   :  { %v47_v16 = vshrl.u32 %v45_v14, 15  ;;  %v48_v17 = vshrl.u32 %v46_v15, 15 }
  0x1f   :  { %v49_v18 = vxor.u32 %v47_v16, %v45_v14  ;;  %v50_v19 = vxor.u32 %v48_v17, %v46_v15 }
  0x21   :  { %v51_v20 = vmul.u32 2221713035, %v49_v18  ;;  %v52_v21 = vmul.u32 2221713035, %v50_v19 }
  0x23   :  { %v53_v22 = vshrl.u32 %v51_v20, 16  ;;  %v54_v23 = vshrl.u32 %v52_v21, 16 }
  0x25   :  { %v55_v24 = vxor.u32 %v53_v22, %v51_v20  ;;  %v56_v26 = vxor.u32 %v54_v23, %v52_v21 }
  0x27   :  { %vm59_vm0 = vcmp.lt.u32.totalorder %v55_v24, 2147483648  ;;  %vm60_vm1 = vcmp.lt.u32.totalorder %v56_v26, 2147483648 }
  0x28   :  { %v61_v28 = vsel %vm59_vm0, %v57_v25, 0.0  ;;  %v62_v29 = vsel %vm60_vm1, %v58_v27, 0.0 }
  0x29   :  { %63 = vst [vmem:[#allocation6] sm:$0xff] %v61_v28  ;;  %64 = vst [vmem:[#allocation6 + $0x8] sm:$0xff] %v62_v29 }
  0x2a   :  { %113 = shalt.err (!%p110_p9)
}
  0x2b   :  { %74 = dma.vmem_to_hbm [thread:$0]  %s72_s1, 256, %s154_s2, [#allocation5]  }
  0x2c   :  { %124 = dma.done.wait [#allocation5], 256  }
  0x2d   :  { %125 = vsyncadd [#allocation5], 4294967040 }
  0x2e   :  { %78 = vsyncpa [#allocation4], 1 }
  0x2f   :  { %79 = vsyncpa [#allocation5], 1 }

</bundles_post_ra>
